<compile_context>
chip_gen: v6e
topology: v6e:2x2x1
jax: 0.10.0
libtpu: 0.0.40
codegen_flags: <defaults>
</compile_context>

<pallas_src>
import functools

import jax
import jax.numpy as jnp
from jax.experimental import pallas as pl
from jax.experimental.pallas import tpu as pltpu


def _msa2_kernel(x_ref, y_ref, bias_ref, wq_ref, bq_ref, wkv_ref, bkv_ref,
                 wo_ref, bo_ref, out_ref, *, nhead, head_dim, bt, lp):
    """One grid step = Bt batch elements.

    x_ref: (Bt, nhid), y_ref: (Bt*Lp, nhid), bias_ref: (Bt, Lp, 1) f32 additive
    mask, weights pre-transposed to (in, out), out_ref: (Bt, nhid) f32.
    """
    nhid = nhead * head_dim

    # ---- projections: big lane-dense MXU matmuls --------------------------
    # q already carries the 1/sqrt(head_dim) scale (folded into WQ / bq).
    q = jnp.dot(x_ref[...], wq_ref[...],
                preferred_element_type=jnp.float32) + bq_ref[...]          # (Bt, nhid)
    kv = jnp.dot(y_ref[...], wkv_ref[...],
                 preferred_element_type=jnp.float32) + bkv_ref[...]        # (Bt*Lp, 2*nhid)

    kv3 = kv.reshape(bt, lp, 2 * nhid)          # Lp is a multiple of 8 -> tile-aligned
    k3 = kv3[:, :, :nhid]                       # (Bt, Lp, nhid)
    v3 = kv3[:, :, nhid:]                       # (Bt, Lp, nhid)

    # ---- head one-hot matrices built in-register (no DMA) -----------------
    # seg[c, h] = 1 iff c // head_dim == h   (range compare; avoids int division)
    ch = jax.lax.broadcasted_iota(jnp.int32, (nhid, nhead), 0)
    lo = jax.lax.broadcasted_iota(jnp.int32, (nhid, nhead), 1) * head_dim
    seg = ((ch >= lo) & (ch < lo + head_dim)).astype(jnp.float32)          # (nhid, nhead)
    ch_t = jax.lax.broadcasted_iota(jnp.int32, (nhead, nhid), 1)
    lo_t = jax.lax.broadcasted_iota(jnp.int32, (nhead, nhid), 0) * head_dim
    seg_t = ((ch_t >= lo_t) & (ch_t < lo_t + head_dim)).astype(jnp.float32)  # (nhead, nhid)

    # ---- scores + masked softmax over L (all f32) --------------------------
    # scores[b, l, h] = sum_d q[b, h*hd + d] * k[b, l, h*hd + d]
    prod = (q[:, None, :] * k3).reshape(bt * lp, nhid)
    scores = jnp.dot(prod, seg,
                     preferred_element_type=jnp.float32).reshape(bt, lp, nhead)
    scores = scores + bias_ref[...]             # additive mask: 0.0 or -1e18

    m = jnp.max(scores, axis=1, keepdims=True)                              # (Bt, 1, nhead)
    e = jnp.exp(scores - m)
    alphas = e / jnp.sum(e, axis=1, keepdims=True)                          # (Bt, Lp, nhead)
    # TODO(synk): nn.Dropout on alphas is identity at inference; not applied here.

    # ---- att[b, c] = sum_l alphas[b, l, c // head_dim] * v[b, l, c] --------
    alpha_exp = jnp.dot(alphas.reshape(bt * lp, nhead), seg_t,
                        preferred_element_type=jnp.float32).reshape(bt, lp, nhid)
    att = jnp.sum(alpha_exp * v3, axis=1)                                   # (Bt, nhid)

    # ---- output projection --------------------------------------------------
    out = jnp.dot(att.astype(wo_ref.dtype), wo_ref[...],
                  preferred_element_type=jnp.float32) + bo_ref[...]         # (Bt, nhid)
    out_ref[...] = out.astype(out_ref.dtype)


def _choose_batch_tile(B, L_pad, target_rows=256, max_bt=128):
    """Pick Bt so Bt*L_pad ~ target MXU rows; Bt is a multiple of 8 or == B."""
    bt = max(1, target_rows // max(L_pad, 1))
    bt = min(bt, max_bt)
    if bt >= B:
        return B                      # single or full-batch blocks (block == full dim)
    return max(8, (bt // 8) * 8)      # sublane-friendly block rows


def msa2_forward(x, y, params, mask=None, *, nhead, compute_dtype=jnp.float32):
    """x: (B, nhid, 1, 1), y: (B, nhid, L, 1), mask: (B, L) bool or None.

    Returns (B, nhid, 1, 1) float32, matching the PyTorch module's forward.
    compute_dtype=bf16 runs the MXU dots in bf16 (softmax path stays f32).
    """
    Wq, bq, Wk, bk, Wv, bv, Wo, bo = params
    B, nhid = x.shape[0], x.shape[1]
    L = y.shape[2]
    assert nhid % nhead == 0
    head_dim = nhid // nhead
    scale = 1.0 / (head_dim ** 0.5)

    # Pad L to a sublane multiple so (Bt*L, .) <-> (Bt, L, .) reshapes in the
    # kernel are tile-aligned; padded positions get an additive -1e18 bias.
    L_pad = max(8, ((L + 7) // 8) * 8)
    bt = _choose_batch_tile(B, L_pad)
    B_pad = ((B + bt - 1) // bt) * bt

    # ---- inputs in lane-dense channel-last layout ---------------------------
    # TODO(synk): this transpose of y costs an extra HBM pass unless XLA fuses
    # it with y's producer; keep y channel-last end-to-end to avoid it.
    x2 = x[:, :, 0, 0].astype(compute_dtype)                                # (B, nhid)
    y3 = jnp.transpose(y[:, :, :, 0], (0, 2, 1)).astype(compute_dtype)      # (B, L, nhid)

    x2 = jnp.pad(x2, ((0, B_pad - B), (0, 0)))
    y3 = jnp.pad(y3, ((0, B_pad - B), (0, L_pad - L), (0, 0)))
    y2 = y3.reshape(B_pad * L_pad, nhid)

    # Additive mask bias: 0 = keep, -1e18 = drop; padded rows/positions -> -1e18.
    if mask is None:
        bias_core = jnp.zeros((B, L), jnp.float32)
    else:
        bias_core = jnp.where(mask, jnp.float32(-1e18), jnp.float32(0.0))
    bias = jnp.full((B_pad, L_pad), -1e18, jnp.float32)
    bias = bias.at[:B, :L].set(bias_core)[:, :, None]                       # (B_pad, L_pad, 1)

    # ---- weights: (out, in) -> (in, out); scale folded into WQ; K/V fused ---
    wq_t = (Wq.T * scale).astype(compute_dtype)                             # (nhid, nhid)
    bq_r = (bq * scale).reshape(1, nhid).astype(jnp.float32)
    wkv_t = jnp.concatenate([Wk.T, Wv.T], axis=1).astype(compute_dtype)     # (nhid, 2*nhid)
    bkv_r = jnp.concatenate([bk, bv]).reshape(1, 2 * nhid).astype(jnp.float32)
    wo_t = Wo.T.astype(compute_dtype)                                       # (nhid, nhid)
    bo_r = bo.reshape(1, nhid).astype(jnp.float32)

    full = lambda shp: pl.BlockSpec(shp, lambda b: tuple(0 for _ in shp))

    kernel = functools.partial(_msa2_kernel, nhead=nhead, head_dim=head_dim,
                               bt=bt, lp=L_pad)

    out = pl.pallas_call(
        kernel,
        out_shape=jax.ShapeDtypeStruct((B_pad, nhid), jnp.float32),
        grid_spec=pltpu.PrefetchScalarGridSpec(
            num_scalar_prefetch=0,
            grid=(B_pad // bt,),
            in_specs=[
                pl.BlockSpec((bt, nhid), lambda b: (b, 0)),                 # x
                pl.BlockSpec((bt * L_pad, nhid), lambda b: (b, 0)),         # y (flattened (B,L))
                pl.BlockSpec((bt, L_pad, 1), lambda b: (b, 0, 0)),          # additive mask bias
                full((nhid, nhid)), full((1, nhid)),                        # WQ^T*s, bq*s
                full((nhid, 2 * nhid)), full((1, 2 * nhid)),                # [WK^T | WV^T], [bk | bv]
                full((nhid, nhid)), full((1, nhid)),                        # WO^T, bo
            ],
            out_specs=pl.BlockSpec((bt, nhid), lambda b: (b, 0)),
        ),
        compiler_params=pltpu.CompilerParams(
            dimension_semantics=("parallel",),        # megacore-shard batch (v7x)
            vmem_limit_bytes=32 * 1024 * 1024,
        ),
    )(x2, y2, bias, wq_t, bq_r, wkv_t, bkv_r, wo_t, bo_r)

    # Back to PyTorch NCHW output convention (B, nhid, 1, 1).
    return out[:B].reshape(B, nhid, 1, 1)


def msa2_reference(x, y, params, mask, *, nhead):
    """Plain-JAX re-implementation of the PyTorch forward, for verification."""
    Wq, bq, Wk, bk, Wv, bv, Wo, bo = params
    B, nhid = x.shape[0], x.shape[1]
    L = y.shape[2]
    head_dim = nhid // nhead

    xv = x[:, :, 0, 0]                     # (B, nhid)
    yv = y[:, :, :, 0]                     # (B, nhid, L)
    q = xv @ Wq.T + bq                     # (B, nhid)
    k = jnp.einsum('oc,bcl->bol', Wk, yv) + bk[None, :, None]   # (B, nhid, L)
    v = jnp.einsum('oc,bcl->bol', Wv, yv) + bv[None, :, None]   # (B, nhid, L)

    q = q.reshape(B, nhead, 1, head_dim)
    k = k.reshape(B, nhead, head_dim, L)
    v = v.reshape(B, nhead, head_dim, L).transpose(0, 1, 3, 2)

    pre = jnp.matmul(q, k) / jnp.sqrt(jnp.float32(head_dim))    # (B, nhead, 1, L)
    if mask is not None:
        pre = jnp.where(mask[:, None, None, :], jnp.float32(-1e18), pre)
    alphas = jax.nn.softmax(pre, axis=3)
    att = jnp.matmul(alphas, v).reshape(B, nhid)
    out = att @ Wo.T + bo
    return out.reshape(B, nhid, 1, 1)


if __name__ == "__main__":
    B, nhid, nhead, L = 2, 32, 4, 16

    key = jax.random.PRNGKey(0)
    ks = jax.random.split(key, 11)

    # Deterministic synthetic parameters (Conv2d 1x1 weights squeezed to (out, in)).
    Wq = jax.random.normal(ks[0], (nhid, nhid), jnp.float32) * 0.1
    bq = jax.random.normal(ks[1], (nhid,), jnp.float32) * 0.1
    Wk = jax.random.normal(ks[2], (nhid, nhid), jnp.float32) * 0.1
    bk = jax.random.normal(ks[3], (nhid,), jnp.float32) * 0.1
    Wv = jax.random.normal(ks[4], (nhid, nhid), jnp.float32) * 0.1
    bv = jax.random.normal(ks[5], (nhid,), jnp.float32) * 0.1
    Wo = jax.random.normal(ks[6], (nhid, nhid), jnp.float32) * 0.1
    bo = jax.random.normal(ks[7], (nhid,), jnp.float32) * 0.1
    params = (Wq, bq, Wk, bk, Wv, bv, Wo, bo)

    # Inputs in PyTorch NCHW convention.
    x = jax.random.normal(ks[8], (B, nhid, 1, 1), jnp.float32)
    y = jax.random.normal(ks[9], (B, nhid, L, 1), jnp.float32)
    mask = jax.random.bernoulli(ks[10], 0.25, (B, L))   # True == masked out

    ref = msa2_reference(x, y, params, mask, nhead=nhead)

    # f32 path (tight tolerance).
    out_f32 = jax.block_until_ready(msa2_forward(x, y, params, mask, nhead=nhead))
    assert out_f32.shape == (B, nhid, 1, 1)
    assert jnp.allclose(out_f32, ref, atol=2e-4, rtol=2e-4), (
        f"f32 max abs err = {jnp.max(jnp.abs(out_f32 - ref))}")

    # bf16 MXU path (weights/activations in bf16, f32 accumulation + softmax).
    out_bf16 = jax.block_until_ready(
        msa2_forward(x, y, params, mask, nhead=nhead, compute_dtype=jnp.bfloat16))
    assert jnp.allclose(out_bf16, ref, atol=5e-2, rtol=5e-2), (
        f"bf16 max abs err = {jnp.max(jnp.abs(out_bf16 - ref))}")

    print("KERNEL_OK")
</pallas_src>

<mosaic_0001>
module attributes {stable_mosaic.version = 11 : i64} {
  func.func @_msa2_kernel(%arg0: i32, %arg1: memref<2x32xf32, #tpu.memory_space<vmem>>, %arg2: memref<32x32xf32, #tpu.memory_space<vmem>>, %arg3: memref<2x16x1xf32, #tpu.memory_space<vmem>>, %arg4: memref<32x32xf32, #tpu.memory_space<vmem>>, %arg5: memref<1x32xf32, #tpu.memory_space<vmem>>, %arg6: memref<32x64xf32, #tpu.memory_space<vmem>>, %arg7: memref<1x64xf32, #tpu.memory_space<vmem>>, %arg8: memref<32x32xf32, #tpu.memory_space<vmem>>, %arg9: memref<1x32xf32, #tpu.memory_space<vmem>>, %arg10: memref<2x32xf32, #tpu.memory_space<vmem>>) attributes {dimension_semantics = [#tpu.dimension_semantics<parallel>], iteration_bounds = array<i64: 1>, scalar_prefetch = 0 : i64, scratch_operands = 0 : i64, tpu.core_type = #tpu.core_type<tc>, window_params = [{transform_indices = @transform_0, window_bounds = array<i64: 2, 32>}, {transform_indices = @transform_1, window_bounds = array<i64: 32, 32>}, {transform_indices = @transform_2, window_bounds = array<i64: 2, 16, 1>}, {pipeline_mode = #tpu.pipeline_mode<synchronous>, transform_indices = @transform_3, window_bounds = array<i64: 32, 32>}, {pipeline_mode = #tpu.pipeline_mode<synchronous>, transform_indices = @transform_4, window_bounds = array<i64: 1, 32>}, {pipeline_mode = #tpu.pipeline_mode<synchronous>, transform_indices = @transform_5, window_bounds = array<i64: 32, 64>}, {pipeline_mode = #tpu.pipeline_mode<synchronous>, transform_indices = @transform_6, window_bounds = array<i64: 1, 64>}, {pipeline_mode = #tpu.pipeline_mode<synchronous>, transform_indices = @transform_7, window_bounds = array<i64: 32, 32>}, {pipeline_mode = #tpu.pipeline_mode<synchronous>, transform_indices = @transform_8, window_bounds = array<i64: 1, 32>}, {transform_indices = @transform_9, window_bounds = array<i64: 2, 32>}]} {
    %c0 = arith.constant 0 : index
    %c0_0 = arith.constant 0 : index
    %0 = vector.load %arg1[%c0, %c0_0] : memref<2x32xf32, #tpu.memory_space<vmem>>, vector<2x32xf32>
    %c0_1 = arith.constant 0 : index
    %c0_2 = arith.constant 0 : index
    %1 = vector.load %arg4[%c0_1, %c0_2] : memref<32x32xf32, #tpu.memory_space<vmem>>, vector<32x32xf32>
    %cst = arith.constant dense<0.000000e+00> : vector<2x32xf32>
    %2 = tpu.matmul %0, %1, %cst {dimension_numbers = #tpu.dot_dimension_numbers<[1], [0], [0], [1], [0, 0, 1, 1], [], []>} : vector<2x32xf32>, vector<32x32xf32>, vector<2x32xf32> -> vector<2x32xf32>
    %c0_3 = arith.constant 0 : index
    %c0_4 = arith.constant 0 : index
    %3 = vector.load %arg5[%c0_3, %c0_4] : memref<1x32xf32, #tpu.memory_space<vmem>>, vector<1x32xf32>
    %4 = vector.broadcast %3 : vector<1x32xf32> to vector<2x32xf32>
    %5 = arith.addf %2, %4 : vector<2x32xf32>
    %c0_5 = arith.constant 0 : index
    %c0_6 = arith.constant 0 : index
    %6 = vector.load %arg2[%c0_5, %c0_6] : memref<32x32xf32, #tpu.memory_space<vmem>>, vector<32x32xf32>
    %c0_7 = arith.constant 0 : index
    %c0_8 = arith.constant 0 : index
    %7 = vector.load %arg6[%c0_7, %c0_8] : memref<32x64xf32, #tpu.memory_space<vmem>>, vector<32x64xf32>
    %cst_9 = arith.constant dense<0.000000e+00> : vector<32x64xf32>
    %8 = tpu.matmul %6, %7, %cst_9 {dimension_numbers = #tpu.dot_dimension_numbers<[1], [0], [0], [1], [0, 0, 1, 1], [], []>} : vector<32x32xf32>, vector<32x64xf32>, vector<32x64xf32> -> vector<32x64xf32>
    %c0_10 = arith.constant 0 : index
    %c0_11 = arith.constant 0 : index
    %9 = vector.load %arg7[%c0_10, %c0_11] : memref<1x64xf32, #tpu.memory_space<vmem>>, vector<1x64xf32>
    %10 = vector.broadcast %9 : vector<1x64xf32> to vector<32x64xf32>
    %11 = arith.addf %8, %10 : vector<32x64xf32>
    %12 = vector.shape_cast %11 : vector<32x64xf32> to vector<2x16x64xf32>
    %13 = vector.extract_strided_slice %12 {offsets = [0, 0, 0], sizes = [2, 16, 32], strides = [1, 1, 1]} : vector<2x16x64xf32> to vector<2x16x32xf32>
    %14 = vector.extract_strided_slice %12 {offsets = [0, 0, 32], sizes = [2, 16, 32], strides = [1, 1, 1]} : vector<2x16x64xf32> to vector<2x16x32xf32>
    %15 = tpu.iota {dimensions = array<i32: 0>} : vector<32x4xi32>
    %16 = tpu.iota {dimensions = array<i32: 1>} : vector<32x4xi32>
    %c8_i32 = arith.constant 8 : i32
    %17 = vector.broadcast %c8_i32 : i32 to vector<32x4xi32>
    %18 = arith.muli %16, %17 : vector<32x4xi32>
    %19 = arith.cmpi sge, %15, %18 : vector<32x4xi32>
    %c8_i32_12 = arith.constant 8 : i32
    %20 = vector.broadcast %c8_i32_12 : i32 to vector<32x4xi32>
    %21 = arith.addi %18, %20 : vector<32x4xi32>
    %22 = arith.cmpi slt, %15, %21 : vector<32x4xi32>
    %23 = arith.andi %19, %22 : vector<32x4xi1>
    %24 = arith.extui %23 : vector<32x4xi1> to vector<32x4xi32>
    %25 = arith.sitofp %24 : vector<32x4xi32> to vector<32x4xf32>
    %26 = tpu.iota {dimensions = array<i32: 1>} : vector<4x32xi32>
    %27 = tpu.iota {dimensions = array<i32: 0>} : vector<4x32xi32>
    %c8_i32_13 = arith.constant 8 : i32
    %28 = vector.broadcast %c8_i32_13 : i32 to vector<4x32xi32>
    %29 = arith.muli %27, %28 : vector<4x32xi32>
    %30 = arith.cmpi sge, %26, %29 : vector<4x32xi32>
    %c8_i32_14 = arith.constant 8 : i32
    %31 = vector.broadcast %c8_i32_14 : i32 to vector<4x32xi32>
    %32 = arith.addi %29, %31 : vector<4x32xi32>
    %33 = arith.cmpi slt, %26, %32 : vector<4x32xi32>
    %34 = arith.andi %30, %33 : vector<4x32xi1>
    %35 = arith.extui %34 : vector<4x32xi1> to vector<4x32xi32>
    %36 = arith.sitofp %35 : vector<4x32xi32> to vector<4x32xf32>
    %37 = vector.shape_cast %5 : vector<2x32xf32> to vector<2x1x32xf32>
    %38 = vector.broadcast %37 : vector<2x1x32xf32> to vector<2x16x32xf32>
    %39 = arith.mulf %38, %13 : vector<2x16x32xf32>
    %40 = vector.shape_cast %39 : vector<2x16x32xf32> to vector<32x32xf32>
    %cst_15 = arith.constant dense<0.000000e+00> : vector<32x4xf32>
    %41 = tpu.matmul %40, %25, %cst_15 {dimension_numbers = #tpu.dot_dimension_numbers<[1], [0], [0], [1], [0, 0, 1, 1], [], []>} : vector<32x32xf32>, vector<32x4xf32>, vector<32x4xf32> -> vector<32x4xf32>
    %42 = vector.shape_cast %41 : vector<32x4xf32> to vector<2x16x4xf32>
    %c0_16 = arith.constant 0 : index
    %c0_17 = arith.constant 0 : index
    %c0_18 = arith.constant 0 : index
    %43 = vector.load %arg3[%c0_16, %c0_17, %c0_18] : memref<2x16x1xf32, #tpu.memory_space<vmem>>, vector<2x16x1xf32>
    %44 = vector.broadcast %43 : vector<2x16x1xf32> to vector<2x16x4xf32>
    %45 = arith.addf %42, %44 : vector<2x16x4xf32>
    %cst_19 = arith.constant dense<0xFF800000> : vector<2x4xf32>
    %46 = vector.multi_reduction <maximumf>, %45, %cst_19 [1] : vector<2x16x4xf32> to vector<2x4xf32>
    %47 = vector.shape_cast %46 : vector<2x4xf32> to vector<2x1x4xf32>
    %48 = vector.broadcast %47 : vector<2x1x4xf32> to vector<2x16x4xf32>
    %49 = arith.subf %45, %48 : vector<2x16x4xf32>
    %50 = math.exp %49 : vector<2x16x4xf32>
    %cst_20 = arith.constant dense<0.000000e+00> : vector<2x4xf32>
    %51 = vector.multi_reduction <add>, %50, %cst_20 [1] : vector<2x16x4xf32> to vector<2x4xf32>
    %52 = vector.shape_cast %51 : vector<2x4xf32> to vector<2x1x4xf32>
    %53 = vector.broadcast %52 : vector<2x1x4xf32> to vector<2x16x4xf32>
    %54 = arith.divf %50, %53 : vector<2x16x4xf32>
    %55 = vector.shape_cast %54 : vector<2x16x4xf32> to vector<32x4xf32>
    %cst_21 = arith.constant dense<0.000000e+00> : vector<32x32xf32>
    %56 = tpu.matmul %55, %36, %cst_21 {dimension_numbers = #tpu.dot_dimension_numbers<[1], [0], [0], [1], [0, 0, 1, 1], [], []>} : vector<32x4xf32>, vector<4x32xf32>, vector<32x32xf32> -> vector<32x32xf32>
    %57 = vector.shape_cast %56 : vector<32x32xf32> to vector<2x16x32xf32>
    %58 = arith.mulf %57, %14 : vector<2x16x32xf32>
    %cst_22 = arith.constant dense<0.000000e+00> : vector<2x32xf32>
    %59 = vector.multi_reduction <add>, %58, %cst_22 [1] : vector<2x16x32xf32> to vector<2x32xf32>
    %c0_23 = arith.constant 0 : index
    %c0_24 = arith.constant 0 : index
    %60 = vector.load %arg8[%c0_23, %c0_24] : memref<32x32xf32, #tpu.memory_space<vmem>>, vector<32x32xf32>
    %cst_25 = arith.constant dense<0.000000e+00> : vector<2x32xf32>
    %61 = tpu.matmul %59, %60, %cst_25 {dimension_numbers = #tpu.dot_dimension_numbers<[1], [0], [0], [1], [0, 0, 1, 1], [], []>} : vector<2x32xf32>, vector<32x32xf32>, vector<2x32xf32> -> vector<2x32xf32>
    %c0_26 = arith.constant 0 : index
    %c0_27 = arith.constant 0 : index
    %62 = vector.load %arg9[%c0_26, %c0_27] : memref<1x32xf32, #tpu.memory_space<vmem>>, vector<1x32xf32>
    %63 = vector.broadcast %62 : vector<1x32xf32> to vector<2x32xf32>
    %64 = arith.addf %61, %63 : vector<2x32xf32>
    %c0_28 = arith.constant 0 : index
    %c0_29 = arith.constant 0 : index
    %65 = vector.load %arg10[%c0_28, %c0_29] : memref<2x32xf32, #tpu.memory_space<vmem>>, vector<2x32xf32>
    tpu.vector_store %arg10[%c0_28, %c0_29], %64 {strides = array<i32>} : memref<2x32xf32, #tpu.memory_space<vmem>>, vector<2x32xf32>,
    return
  }
  func.func @transform_0(%arg0: i32) -> (i32, i32) {
    %c0_i32 = arith.constant 0 : i32
    %c0_i32_0 = arith.constant 0 : i32
    return %arg0, %c0_i32 : i32, i32
  }
  func.func @transform_1(%arg0: i32) -> (i32, i32) {
    %c0_i32 = arith.constant 0 : i32
    %c0_i32_0 = arith.constant 0 : i32
    return %arg0, %c0_i32 : i32, i32
  }
  func.func @transform_2(%arg0: i32) -> (i32, i32, i32) {
    %c0_i32 = arith.constant 0 : i32
    %c0_i32_0 = arith.constant 0 : i32
    %c0_i32_1 = arith.constant 0 : i32
    return %arg0, %c0_i32, %c0_i32_0 : i32, i32, i32
  }
  func.func @transform_3(%arg0: i32) -> (i32, i32) {
    %c0_i32 = arith.constant 0 : i32
    %c0_i32_0 = arith.constant 0 : i32
    %c0_i32_1 = arith.constant 0 : i32
    return %c0_i32, %c0_i32_0 : i32, i32
  }
  func.func @transform_4(%arg0: i32) -> (i32, i32) {
    %c0_i32 = arith.constant 0 : i32
    %c0_i32_0 = arith.constant 0 : i32
    %c0_i32_1 = arith.constant 0 : i32
    return %c0_i32, %c0_i32_0 : i32, i32
  }
  func.func @transform_5(%arg0: i32) -> (i32, i32) {
    %c0_i32 = arith.constant 0 : i32
    %c0_i32_0 = arith.constant 0 : i32
    %c0_i32_1 = arith.constant 0 : i32
    return %c0_i32, %c0_i32_0 : i32, i32
  }
  func.func @transform_6(%arg0: i32) -> (i32, i32) {
    %c0_i32 = arith.constant 0 : i32
    %c0_i32_0 = arith.constant 0 : i32
    %c0_i32_1 = arith.constant 0 : i32
    return %c0_i32, %c0_i32_0 : i32, i32
  }
  func.func @transform_7(%arg0: i32) -> (i32, i32) {
    %c0_i32 = arith.constant 0 : i32
    %c0_i32_0 = arith.constant 0 : i32
    %c0_i32_1 = arith.constant 0 : i32
    return %c0_i32, %c0_i32_0 : i32, i32
  }
  func.func @transform_8(%arg0: i32) -> (i32, i32) {
    %c0_i32 = arith.constant 0 : i32
    %c0_i32_0 = arith.constant 0 : i32
    %c0_i32_1 = arith.constant 0 : i32
    return %c0_i32, %c0_i32_0 : i32, i32
  }
  func.func @transform_9(%arg0: i32) -> (i32, i32) {
    %c0_i32 = arith.constant 0 : i32
    %c0_i32_0 = arith.constant 0 : i32
    return %arg0, %c0_i32 : i32, i32
  }
}

</mosaic_0001>

<bundles_post_ra>
// kernel: tpu_custom_call.1
= control target key start
LH: loop header
LB: loop body
LE: loop exit
PB: predicated region body
PF: predicated region fallthrough
CT: control target
= control target key end

     0   :  { %14 = vsyncpa [#allocation3], 0  ;;  %s1161_s0 = inlined_call_operand.vmem [shape: f32[2,32], index: 0, kind: input, shape index: {}]   ;;  %s1162_s1 = inlined_call_operand.vmem [shape: f32[32,32], index: 1, kind: input, shape index: {}]   ;;  %s1163_s2 = inlined_call_operand.vmem [shape: f32[2,16,1], index: 2, kind: input, shape index: {}]   ;;  %s1164_s3 = inlined_call_operand.hbm [shape: f32[32,32], index: 3, kind: input, shape index: {}]   ;;  %s1165_s4 = inlined_call_operand.vmem [shape: f32[1,32], index: 4, kind: input, shape index: {}]   ;;  %s1166_s5 = inlined_call_operand.hbm [shape: f32[32,64], index: 5, kind: input, shape index: {}]   ;;  %s1167_s6 = inlined_call_operand.vmem [shape: f32[1,64], index: 6, kind: input, shape index: {}]   ;;  %s1168_s7 = inlined_call_operand.hbm [shape: f32[32,32], index: 7, kind: input, shape index: {}]   ;;  %s1169_s8 = inlined_call_operand.vmem [shape: f32[1,32], index: 8, kind: input, shape index: {}]   ;;  %s1170_s9 = inlined_call_operand.hbm [shape: f32[2,32], index: 9, kind: output, shape index: {}]  }
   0x1   :  { %15 = vsyncpa [#allocation6], 0 }
   0x2   :  { %16 = vsyncpa [#allocation4], 0  ;;  %s997_s30 = smov [#allocation5]   ;;  %s998_s11 = smov [#allocation2]  }
   0x3   :  { %s42_s10 = sshll.u32 %s997_s30, 4  ;;  %s28_s12 = sshll.u32 %s998_s11, 4  ;;  %s43_s10 = int_to_ptr.vmem [resolvable:$true] %s42_s10  ;;  %s29_s12 = int_to_ptr.vmem [resolvable:$true] %s28_s12 }
   0x4   :  { %s919_s13 = scalar_lea.vmem %s43_s10, 512  ;;  %p924_p1 = scmp.lt.s32.totalorder %s43_s10, %s43_s10 }
   0x5   :  { %p920_p0 = scmp.ne.s32.totalorder %s43_s10, %s919_s13  ;;  %p925_p2 = scmp.lt.s32.totalorder %s919_s13, %s919_s13 }
   0x7   :  { %p926_p3 = por %p925_p2, %p924_p1 }
   0x9   :  { %p927_p4 = pnand %p926_p3, %p920_p0 }
   0xb   :  { %930 = shalt.err (!%p927_p4)
}
   0xc   :  { %s999_s14 = smov 128   ;;  %s1000_s15 = smov 8  }
   0xd   :  { %48 = dma.hbm_to_vmem [thread:$0]  %s1166_s5, 512, %s43_s10, [#allocation6], %s999_s14, %s999_s14, %s1000_s15  }
   0xe   :  { %s939_s18 = scalar_lea.vmem %s29_s12, 512  ;;  %p944_p6 = scmp.lt.s32.totalorder %s29_s12, %s29_s12 }
   0xf   :  { %p940_p5 = scmp.ne.s32.totalorder %s29_s12, %s939_s18  ;;  %p945_p7 = scmp.lt.s32.totalorder %s939_s18, %s939_s18 }
  0x11   :  { %p946_p8 = por %p945_p7, %p944_p6 }
  0x13   :  { %p947_p9 = pnand %p946_p8, %p940_p5 }
  0x15   :  { %950 = shalt.err (!%p947_p9)
}
  0x16   :  { %34 = dma.hbm_to_vmem [thread:$0]  %s1164_s3, 512, %s29_s12, [#allocation3], %s999_s14, %s999_s14, %s1000_s15  }
  0x17   :  { %s1001_s21 = smov [#allocation7]  }
  0x18   :  { %s56_s22 = sshll.u32 %s1001_s21, 4  ;;  %s57_s22 = int_to_ptr.vmem [resolvable:$true] %s56_s22 }
  0x19   :  { %s959_s23 = scalar_lea.vmem %s57_s22, 512  ;;  %p964_p11 = scmp.lt.s32.totalorder %s57_s22, %s57_s22 }
  0x1a   :  { %p960_p10 = scmp.ne.s32.totalorder %s57_s22, %s959_s23  ;;  %p965_p12 = scmp.lt.s32.totalorder %s959_s23, %s959_s23 }
  0x1c   :  { %p966_p13 = por %p965_p12, %p964_p11 }
  0x1e   :  { %p967_p0 = pnand %p966_p13, %p960_p10 }
  0x20   :  { %970 = shalt.err (!%p967_p0)
}
  0x21   :  { %62 = dma.hbm_to_vmem [thread:$0]  %s1168_s7, 512, %s57_s22, [#allocation6], %s999_s14, %s999_s14, %s1000_s15  }
  0x22   :  { %991 = dma.done.wait [#allocation3], 512  }
  0x23   :  { %992 = vsyncadd [#allocation3], 4294966784 }
  0x24   :  { %993 = dma.done.wait [#allocation6], 1024  }
  0x25   :  { %994 = vsyncadd [#allocation6], 4294966272  ;;  %v1002_v0 = vmov 0.0   ;;  %vm1003_vm0 = vmmov 0   ;;  %v1004_v1 = vmov 0   ;;  %v78_v2 = vld [vmem:[#allocation2 + $0x18] sm:$0xff]  ;;  %v272_v19 = vlaneseq }
  0x26   :  { %827 = vmatprep.subr.mxu0 %v1002_v0  ;;  %835 = vmatprep.mubr.msk.f32.mxu0 %vm1003_vm0, %v1002_v0  ;;  %v167_v3 = vld [vmem:[#allocation5 + $0x18] sm:$0xff]  ;;  %v77_v4 = vld [vmem:[#allocation2 + $0x10] sm:$0xff]  ;;  %v76_v6 = vld [vmem:[#allocation2 + $0x8] sm:$0xff]  ;;  %vm86_vm1 = vcmask 261120   ;;  %v1005_v26 = vmov 1.0   ;;  %s1007_s21 = smov 96  }
  0x27   :  { %898 = vset.pattern.permute.xlu1 %v1004_v1  ;;  %897 = vset.pattern.permute.xlu0 %v1004_v1  ;;  %v166_v5 = vld [vmem:[#allocation5 + $0x10] sm:$0xff]  ;;  %v165_v7 = vld [vmem:[#allocation5 + $0x8] sm:$0xff]  ;;  %v75_v8 = vld [vmem:[#allocation2] sm:$0xff]  ;;  %v1106_v20 = vand.u32 127, %v272_v19  ;;  %v1108_v21 = vshrl.u32 %v272_v19, 7  ;;  %s1008_s22 = smov [#allocation8]  }
  0x28   :  { %828 = vmatpush3.msra.mxu0 %v78_v2  ;;  %838 = vmatprep.subr.mxu1 %v167_v3  ;;  %v164_v9 = vld [vmem:[#allocation5] sm:$0xff]  ;;  %v444_v12 = vld [vmem:[%s1163_s2 + $0x10] sm:$0xff]  ;;  %v161_v13 = vld [vmem:[%s1162_s1 + $0x8] sm:$0xff]  ;;  %v1006_v28 = vmov 1966171168   ;;  %s759_s23 = sshll.u32 %s1008_s22, 4  ;;  %s760_s23 = int_to_ptr.vmem [resolvable:$true] %s759_s23 }
  0x29   :  { %829 = vmatprep.subr.mxu0 %v1002_v0  ;;  %839 = vmatpush3.msra.mxu1 %v167_v3  ;;  %v74_v10 = vld [vmem:[%s1161_s0] sm:$0x3]  ;;  %v162_v15 = vld [vmem:[%s1162_s1 + $0x10] sm:$0xff]  ;;  %v445_v16 = vld [vmem:[%s1163_s2 + $0x18] sm:$0xff]  ;;  %v279_v22 = vmul.u32 8, %v1106_v20  ;;  %v276_v23 = vadd.s32 24, %v1108_v21  ;;  %v310_v29 = vunpack.c.l.s4 %v1006_v28  ;;  %p976_p2 = scmp.lt.s32.totalorder %s760_s23, %s760_s23 }
  0x2a   :  { %830 = vmatpush3.msra.mxu0 %v77_v4  ;;  %840 = vmatprep.subr.mxu1 %v166_v5  ;;  %v160_v11 = vld [vmem:[%s1162_s1] sm:$0xff]  ;;  %v163_v17 = vld [vmem:[%s1162_s1 + $0x18] sm:$0xff]  ;;  %v443_v18 = vld [vmem:[%s1163_s2 + $0x8] sm:$0xff]  ;;  %v275_v25 = vadd.s32 16, %v1108_v21  ;;  %v274_v27 = vadd.s32 8, %v1108_v21  ;;  %v333_v40 = vsub.s32 0, %v1108_v21 }
  0x2b   :  { %831 = vmatprep.subr.mxu0 %v1002_v0  ;;  %841 = vmatpush3.msra.mxu1 %v166_v5  ;;  %v442_v14 = vld [vmem:[%s1163_s2] sm:$0xff]  ;;  %v284_v24 = vadd.s32 8, %v279_v22  ;;  %vm283_vm2 = vcmp.ge.s32.totalorder %v276_v23, %v279_v22  ;;  %vm280_vm11 = vcmp.ge.s32.totalorder %v1108_v21, %v279_v22  ;;  %v311_v30 = vunpack.c.0.s8 %v310_v29  ;;  %s971_s5 = scalar_lea.vmem %s760_s23, 32 }
  0x2c   :  { %832 = vmatpush3.msra.mxu0 %v76_v6  ;;  %842 = vmatprep.subr.mxu1 %v165_v7  ;;  %vm282_vm5 = vcmp.ge.s32.totalorder %v275_v25, %v279_v22  ;;  %vm281_vm8 = vcmp.ge.s32.totalorder %v274_v27, %v279_v22  ;;  %v769_v31 = vld [vmem:[%s1165_s4] ss:$0 sm:$0xff]  ;;  %v301_v56 = vmul.u32 8, %v1108_v21  ;;  %p972_p1 = scmp.ne.s32.totalorder %s760_s23, %s971_s5  ;;  %p977_p3 = scmp.lt.s32.totalorder %s971_s5, %s971_s5 }
  0x2d   :  { %833 = vmatprep.subr.mxu0 %v1002_v0  ;;  %843 = vmatpush3.msra.mxu1 %v165_v7  ;;  %vm288_vm3 = vcmp.lt.s32.totalorder %v276_v23, %v284_v24  ;;  %vm287_vm6 = vcmp.lt.s32.totalorder %v275_v25, %v284_v24  ;;  %vm286_vm9 = vcmp.lt.s32.totalorder %v274_v27, %v284_v24  ;;  %v771_v34 = vld [vmem:[%s1167_s6] ss:$0 sm:$0xff] }
  0x2e   :  { %834 = vmatpush3.msra.mxu0 %v75_v8  ;;  %844 = vmatprep.subr.mxu1 %v164_v9  ;;  %vm292_vm4 = vmand %vm283_vm2, %vm288_vm3  ;;  %vm285_vm12 = vcmp.lt.s32.totalorder %v1108_v21, %v284_v24  ;;  %v314_v32 = vsub.s32 %v311_v30, %v1108_v21  ;;  %vm302_vm14 = vcmp.ge.s32.totalorder %v1106_v20, %v301_v56  ;;  %v303_v57 = vadd.s32 8, %v301_v56  ;;  %p978_p4 = por %p977_p3, %p976_p2 }
  0x2f   :  { %836 = vmatmul.mubr.msk.f32.vlgmr.msra.gmra.mxu0 %vm86_vm1, %v74_v10  ;;  %845 = vmatpush3.msra.mxu1 %v164_v9  ;;  %vm291_vm7 = vmand %vm282_vm5, %vm287_vm6  ;;  %vm537_vm2 = vcmask 1043456   ;;  %vm751_vm5 = vcmask 254976  }
  0x30   :  { %846 = vmatprep.mubr.msk.f32.mxu1 %vm86_vm1, %v160_v11  ;;  %458 = vperm.xlu1 %898, %v444_v12   ;;  %vm290_vm10 = vmand %vm281_vm8, %vm286_vm9  ;;  %vm304_vm15 = vcmp.lt.s32.totalorder %v1106_v20, %v303_v57  ;;  %p979_p5 = pnand %p978_p4, %p972_p1 }
  0x31   :  { %847 = vmatmul.mubr.msk.f32.vlgmr.msra.gmra.mxu1 %vm86_vm1, %v161_v13  ;;  %448 = vperm.xlu0 %897, %v442_v14   ;;  %vm289_vm13 = vmand %vm280_vm11, %vm285_vm12 }
  0x32   :  { %849 = vmatprep.mubr.msk.f32.mxu1 %vm86_vm1, %v162_v15  ;;  %852 = vmatprep.subr.msk.mxu0 %vm292_vm4, %v1005_v26  ;;  %vm305_vm3 = vmand %vm302_vm14, %vm304_vm15 }
  0x33   :  { %853 = vmatpush3.msk.msra.mxu0 %vm292_vm4, %v1005_v26  ;;  %v780_v58 = vsel %vm305_vm3, 1.0, %v1002_v0  ;;  %vm470_vm4 = vcmask 31744  }
  0x34   :  { %463 = vperm.xlu1 %898, %v445_v16   ;;  %854 = vmatprep.subr.msk.mxu0 %vm291_vm7, %v1005_v26 }
  0x35   :  { %850 = vmatmul.mubr.msk.f32.gmra.mxu1 %vm86_vm1, %v163_v17  ;;  %453 = vperm.xlu0 %897, %v443_v18  }
  0x36   :  { %855 = vmatpush3.msk.msra.mxu0 %vm291_vm7, %v1005_v26  ;;  %866 = vmatprep.subr.msk.mxu1 %vm537_vm2, %v780_v58 }
  0x37   :  { %856 = vmatprep.subr.msk.mxu0 %vm290_vm10, %v1005_v26  ;;  %867 = vmatpush3.msk.msra.mxu1 %vm537_vm2, %v780_v58 }
  0x38   :  { %857 = vmatpush3.msk.msra.mxu0 %vm290_vm10, %v1005_v26 }
  0x39   :  { %858 = vmatprep.subr.msk.mxu0 %vm289_vm13, %v1005_v26 }
  0x3a   :  { %859 = vmatpush3.msk.msra.mxu0 %vm289_vm13, %v1005_v26 }
  0x3b   :  { %874 = vmatprep.subr.mxu0 %v1002_v0 }
  0xab   :  { %v459_v60 = vpop.permute.xlu1 %458 }
  0xac   :  { %v449_v59 = vpop.permute.xlu0 %448 }
  0xaf   :  { %v464_v3 = vpop.permute.xlu1 %463 }
  0xb0   :  { %v454_v61 = vpop.permute.xlu0 %453 }
  0xef   :  { %v156_v33 = vpop.f32.mrf.mxu0 }
  0xf0   :  { %v157_v35 = vadd.f32 %v769_v31, %v156_v33 }
  0xf1   :  { %v837_v36 = vpop.f32.mrf.mxu0  ;;  %v848_v37 = vpop.f32.mrf.mxu1 }
  0xf2   :  { %v315_v38 = vrot.slane %v157_v35, %v314_v32  ;;  %v259_v39 = vadd.f32 %v848_v37, %v771_v34 }
  0xf3   :  { %v253_v41 = vpop.f32.mrf.mxu1 }
  0xf4   :  { %v316_v42 = vcombine.high %v315_v38, %v315_v38  ;;  %v323_v43 = vrot.slane %v315_v38, %v314_v32  ;;  %v254_v44 = vadd.f32 %v771_v34, %v253_v41  ;;  %632 = vrot.lane.b32.xlu1 %v259_v39, %s1007_s21 }
  0xf5   :  { %v851_v45 = vpop.f32.mrf.mxu1 }
  0xf6   :  { %v334_v46 = vrot.slane %v323_v43, %v333_v40  ;;  %v269_v47 = vadd.f32 %v851_v45, %v771_v34  ;;  %v330_v48 = vrot.slane %v316_v42, %v314_v32  ;;  %630 = vrot.lane.b32.xlu0 %v254_v44, %s1007_s21 }
  0xf7   :  { %v263_v49 = vpop.f32.mrf.mxu1 }
  0xf8   :  { %v342_v50 = vmul.f32 %v334_v46, %v259_v39  ;;  %v341_v51 = vmul.f32 %v334_v46, %v254_v44  ;;  %v338_v52 = vrot.slane %v330_v48, %v333_v40  ;;  %v264_v53 = vadd.f32 %v771_v34, %v263_v49  ;;  %636 = vrot.lane.b32.xlu1 %v269_v47, %s1007_s21 }
  0xfa   :  { %v343_v54 = vmul.f32 %v338_v52, %v264_v53  ;;  %634 = vrot.lane.b32.xlu0 %v264_v53, %s1007_s21  ;;  %860 = vmatprep.mubr.msk.f32.mxu0 %vm86_vm1, %v341_v51  ;;  %v344_v55 = vmul.f32 %v338_v52, %v269_v47 }
  0xfb   :  { %861 = vmatmul.mubr.msk.f32.vlgmr.msra.gmra.mxu0 %vm86_vm1, %v342_v50 }
  0xfc   :  { %863 = vmatprep.mubr.msk.f32.mxu0 %vm86_vm1, %v343_v54 }
  0xff   :  { %864 = vmatmul.mubr.msk.f32.gmra.mxu0 %vm86_vm1, %v344_v55 }
 0x100   :  { %882 = vmatprep.mubr.msk.f32.mxu0 %vm1003_vm0, %v1002_v0  ;;  %vm677_vm0 = vcmask 1041409  }
 0x1bb   :  { %v862_v62 = vpop.f32.mrf.mxu0 }
 0x1bc   :  { %v467_v63 = vadd.f32 %v862_v62, %v454_v61  ;;  %v667_v62 = vld [vmem:[#allocation7 + $0x18] sm:$0xff] }
 0x1bd   :  { %v423_v1 = vpop.f32.mrf.mxu0  ;;  %875 = vmatpush3.msra.mxu0 %v667_v62 }
 0x1be   :  { %v466_v2 = vadd.f32 %v449_v59, %v423_v1  ;;  %v472_v5 = vsel %vm470_vm4, %v467_v63, -inf  ;;  %876 = vmatprep.subr.mxu0 %v1002_v0  ;;  %v665_v1 = vld [vmem:[#allocation7 + $0x8] sm:$0xff] }
 0x1bf   :  { %v865_v4 = vpop.f32.mrf.mxu0 }
 0x1c0   :  { %v471_v6 = vsel %vm470_vm4, %v466_v2, -inf  ;;  %v469_v7 = vadd.f32 %v865_v4, %v464_v3  ;;  %v633_v3 = vpop.permute.xlu1 %632  ;;  %v631_v4 = vpop.permute.xlu0 %630 }
 0x1c1   :  { %v473_v8 = vmax.f32 %v471_v6, %v472_v5  ;;  %v433_v9 = vpop.f32.mrf.mxu0 }
 0x1c2   :  { %v468_v10 = vadd.f32 %v459_v60, %v433_v9  ;;  %v481_v12 = vsel %vm470_vm4, %v469_v7, -inf }
 0x1c3   :  { %v474_v11 = vrot.slane %v473_v8, 4 }
 0x1c4   :  { %v480_v13 = vsel %vm470_vm4, %v468_v10, -inf  ;;  %v637_v9 = vpop.permute.xlu1 %636 }
 0x1c5   :  { %v475_v14 = vmax.f32 %v473_v8, %v474_v11  ;;  %v482_v15 = vmax.f32 %v480_v13, %v481_v12 }
 0x1c7   :  { %v476_v16 = vrot.slane %v475_v14, 2  ;;  %v483_v17 = vrot.slane %v482_v15, 4 }
 0x1c9   :  { %v477_v18 = vmax.f32 %v475_v14, %v476_v16  ;;  %v484_v19 = vmax.f32 %v482_v15, %v483_v17  ;;  %v635_v14 = vpop.permute.xlu0 %634 }
 0x1cb   :  { %v478_v20 = vrot.slane %v477_v18, 1  ;;  %v485_v21 = vrot.slane %v484_v19, 2 }
 0x1cd   :  { %v479_v22 = vmax.f32 %v477_v18, %v478_v20  ;;  %v486_v23 = vmax.f32 %v484_v19, %v485_v21 }
 0x1cf   :  { %v489_v24 = vsub.f32 %v466_v2, %v479_v22  ;;  %v490_v25 = vsub.f32 %v467_v63, %v479_v22  ;;  %v487_v26 = vrot.slane %v486_v23, 1  ;;  %v666_v63 = vld [vmem:[#allocation7 + $0x10] sm:$0xff]  ;;  %v664_v2 = vld [vmem:[#allocation7] sm:$0xff] }
 0x1d0   :  { %877 = vmatpush3.msra.mxu0 %v666_v63 }
 0x1d1   :  { %v493_v27 = vmul.f32 1.442695, %v489_v24  ;;  %v495_v28 = vmul.f32 1.442695, %v490_v25  ;;  %v488_v29 = vmax.f32 %v486_v23, %v487_v26  ;;  %878 = vmatprep.subr.mxu0 %v1002_v0 }
 0x1d2   :  { %879 = vmatpush3.msra.mxu0 %v665_v1 }
 0x1d3   :  { %899 = vpow2.f32 %v493_v27  ;;  %v491_v30 = vsub.f32 %v468_v10, %v488_v29  ;;  %v492_v31 = vsub.f32 %v469_v7, %v488_v29  ;;  %880 = vmatprep.subr.mxu0 %v1002_v0 }
 0x1d4   :  { %901 = vpow2.f32 %v495_v28  ;;  %881 = vmatpush3.msra.mxu0 %v664_v2 }
 0x1d5   :  { %v497_v32 = vmul.f32 1.442695, %v491_v30  ;;  %v499_v33 = vmul.f32 1.442695, %v492_v31 }
 0x1d7   :  { %903 = vpow2.f32 %v497_v32 }
 0x1d8   :  { %905 = vpow2.f32 %v499_v33  ;;  %v794_v33 = vld [vmem:[%s1169_s8] ss:$0 sm:$0xff] }
 0x1e0   :  { %v900_v34 = vpop.eup %899 }
 0x1e1   :  { %v902_v35 = vpop.eup %901  ;;  %v501_v36 = vsel %vm470_vm4, %v900_v34, 0.0 }
 0x1e2   :  { %v502_v37 = vsel %vm470_vm4, %v902_v35, 0.0 }
 0x1e3   :  { %v503_v38 = vadd.f32 %v502_v37, %v501_v36 }
 0x1e4   :  { %v904_v39 = vpop.eup %903 }
 0x1e5   :  { %v906_v40 = vpop.eup %905  ;;  %v504_v41 = vrot.slane %v503_v38, 4  ;;  %v510_v42 = vsel %vm470_vm4, %v904_v39, 0.0 }
 0x1e6   :  { %v511_v43 = vsel %vm470_vm4, %v906_v40, 0.0 }
 0x1e7   :  { %v505_v44 = vadd.f32 %v504_v41, %v503_v38  ;;  %v512_v45 = vadd.f32 %v511_v43, %v510_v42 }
 0x1e9   :  { %v506_v46 = vrot.slane %v505_v44, 2  ;;  %v513_v47 = vrot.slane %v512_v45, 4 }
 0x1eb   :  { %v507_v48 = vadd.f32 %v506_v46, %v505_v44  ;;  %v514_v49 = vadd.f32 %v513_v47, %v512_v45 }
 0x1ed   :  { %v515_v50 = vrot.slane %v514_v49, 2  ;;  %v508_v51 = vrot.slane %v507_v48, 1 }
 0x1ef   :  { %v516_v52 = vadd.f32 %v515_v50, %v514_v49  ;;  %v509_v53 = vadd.f32 %v508_v51, %v507_v48 }
 0x1f1   :  { %907 = vrcp.f32 %v509_v53  ;;  %v517_v54 = vrot.slane %v516_v52, 1 }
 0x1f3   :  { %v518_v55 = vadd.f32 %v517_v54, %v516_v52 }
 0x1f5   :  { %909 = vrcp.f32 %v518_v55 }
 0x1fe   :  { %v908_v56 = vpop.eup %907 }
 0x1ff   :  { %v520_v57 = vmul.f32 %v908_v56, %v900_v34  ;;  %v521_v58 = vmul.f32 %v908_v56, %v902_v35 }
 0x201   :  { %868 = vmatprep.mubr.msk.f32.mxu1 %vm470_vm4, %v520_v57 }
 0x202   :  { %v910_v59 = vpop.eup %909  ;;  %869 = vmatmul.mubr.msk.f32.vlgmr.msra.gmra.mxu1 %vm470_vm4, %v521_v58 }
 0x203   :  { %v523_v60 = vmul.f32 %v910_v59, %v904_v39  ;;  %v524_v61 = vmul.f32 %v910_v59, %v906_v40 }
 0x205   :  { %871 = vmatprep.mubr.msk.f32.mxu1 %vm470_vm4, %v523_v60 }
 0x206   :  { %872 = vmatmul.mubr.msk.f32.gmra.mxu1 %vm470_vm4, %v524_v61 }
 0x2c2   :  { %v870_v5 = vpop.f32.mrf.mxu1 }
 0x2c3   :  { %v643_v6 = vmul.f32 %v870_v5, %v633_v3 }
 0x2c4   :  { %v607_v7 = vpop.f32.mrf.mxu1 }
 0x2c5   :  { %v642_v8 = vmul.f32 %v631_v4, %v607_v7  ;;  %v647_v11 = vsel %vm86_vm1, %v643_v6, 0.0 }
 0x2c6   :  { %v873_v10 = vpop.f32.mrf.mxu1 }
 0x2c7   :  { %v646_v12 = vsel %vm86_vm1, %v642_v8, 0.0  ;;  %v645_v13 = vmul.f32 %v873_v10, %v637_v9 }
 0x2c8   :  { %v648_v15 = vadd.f32 %v647_v11, %v646_v12  ;;  %v617_v16 = vpop.f32.mrf.mxu1 }
 0x2c9   :  { %v644_v17 = vmul.f32 %v635_v14, %v617_v16  ;;  %v656_v0 = vsel %vm86_vm1, %v645_v13, 0.0 }
 0x2ca   :  { %v649_v18 = vrot.slane %v648_v15, 4 }
 0x2cb   :  { %v655_v19 = vsel %vm86_vm1, %v644_v17, 0.0 }
 0x2cc   :  { %v650_v20 = vadd.f32 %v649_v18, %v648_v15  ;;  %v657_v21 = vadd.f32 %v656_v0, %v655_v19 }
 0x2ce   :  { %v651_v22 = vrot.slane %v650_v20, 2  ;;  %v658_v23 = vrot.slane %v657_v21, 4 }
 0x2d0   :  { %v652_v24 = vadd.f32 %v651_v22, %v650_v20  ;;  %v659_v25 = vadd.f32 %v658_v23, %v657_v21 }
 0x2d2   :  { %v660_v26 = vrot.slane %v659_v25, 2  ;;  %v653_v27 = vrot.slane %v652_v24, 1 }
 0x2d4   :  { %v661_v28 = vadd.f32 %v660_v26, %v659_v25  ;;  %v654_v30 = vadd.f32 %v653_v27, %v652_v24 }
 0x2d6   :  { %v662_v29 = vrot.slane %v661_v28, 1 }
 0x2d8   :  { %v663_v31 = vadd.f32 %v662_v29, %v661_v28 }
 0x2da   :  { %v678_v32 = vsel %vm677_vm0, %v663_v31, %v654_v30 }
 0x2db   :  { %883 = vmatmul.mubr.msk.f32.vlgmr.msra.gmra.mxu0 %vm86_vm1, %v678_v32 }
 0x39b   :  { %v747_v34 = vpop.f32.mrf.mxu0 }
 0x39c   :  { %v748_v35 = vadd.f32 %v794_v33, %v747_v34 }
 0x39d   :  { %v884_v36 = vpop.f32.mrf.mxu0 }
 0x39e   :  { %752 = vst.msk [vmem:[#allocation8] sm:$0x3] %vm751_vm5, %v748_v35 }
 0x39f   :  { %982 = shalt.err (!%p979_p5)
}
 0x3a0   :  { %762 = dma.vmem_to_hbm [thread:$0]  %s760_s23, 32, %s1170_s9, [#allocation4]  }
 0x3a1   :  { %995 = dma.done.wait [#allocation4], 32  }
 0x3a2   :  { %996 = vsyncadd [#allocation4], 4294967264 }
 0x3a3   :  { %766 = vsyncpa [#allocation3], 1 }
 0x3a4   :  { %767 = vsyncpa [#allocation6], 1 }
 0x3a5   :  { %768 = vsyncpa [#allocation4], 1 }

</bundles_post_ra>
